<compile_context>
chip_gen: v7x
topology: tpu7x:2x2x1
jax: 0.10.0
libtpu: 0.0.40
codegen_flags: <defaults>
</compile_context>

<pallas_src>
import functools

import jax
import jax.numpy as jnp
import numpy as np
from jax.experimental import pallas as pl
from jax.experimental.pallas import tpu as pltpu

_SUBLANE = 8
_HEAD_OUT = 8  # 2 classifier logits + 1 risk output, zero-padded to 8 lanes


def _round_up(n: int, m: int) -> int:
    return ((n + m - 1) // m) * m


def _mlp_kernel(x_ref, w1_ref, b1_ref, w2_ref, b2_ref, wh_ref, bh_ref, o_ref):
    # Layer 1: (TB, F) @ (F, H) -> f32 acc, +b1, ReLU   (bf16 MXU path, f32 epilogue)
    h = jnp.dot(x_ref[...], w1_ref[...], preferred_element_type=jnp.float32)
    h = jnp.maximum(h + b1_ref[...], 0.0)
    # Layer 2: (TB, H) @ (H, H) -> f32 acc, +b2, ReLU
    h = jnp.dot(h.astype(w2_ref.dtype), w2_ref[...], preferred_element_type=jnp.float32)
    h = jnp.maximum(h + b2_ref[...], 0.0)
    # Fused heads: [classifier(2) | risk(1) | 0-pad] packed into 8 output lanes.
    # TODO(synk): train-mode dropout (stochastic masking via pltpu.prng_random_bits)
    # is not implemented; this is the eval-mode forward (dropout = identity).
    o = jnp.dot(h.astype(wh_ref.dtype), wh_ref[...], preferred_element_type=jnp.float32)
    o_ref[...] = (o + bh_ref[...]).astype(o_ref.dtype)


def pack_deepsurv_params(params):
    """Pack params for the fused kernel.

    Input layout is input-major (y = x @ w + b):
      w1 (F, H), b1 (H,), w2 (H, H), b2 (H,), wc (H, 2), bc (2,), wr (H, 1), br (1,)
    Weights are cast to bf16 (native MXU path, half the HBM/VMEM bytes); biases stay
    f32 so the elementwise epilogue is pure f32.  The two heads are fused into one
    (H, 8) matrix: columns [logit0, logit1, risk, 0, 0, 0, 0, 0].
    """
    bf16, f32 = jnp.bfloat16, jnp.float32
    w1, b1 = params["w1"], params["b1"]
    w2, b2 = params["w2"], params["b2"]
    H = w1.shape[1]
    wh = jnp.concatenate([params["wc"], params["wr"]], axis=1)  # (H, 3)
    bh = jnp.concatenate([params["bc"], params["br"]], axis=0)  # (3,)
    wh = jnp.pad(wh, ((0, 0), (0, _HEAD_OUT - wh.shape[1])))
    bh = jnp.pad(bh, ((0, _HEAD_OUT - bh.shape[0]),))
    return dict(
        w1=w1.astype(bf16),
        b1=b1.astype(f32).reshape(1, H),
        w2=w2.astype(bf16),
        b2=b2.astype(f32).reshape(1, H),
        wh=wh.astype(bf16),
        bh=bh.astype(f32).reshape(1, _HEAD_OUT),
    )


def _choose_block_b(B: int) -> int:
    """Batch tile: big (<=2048 rows) to amortize per-grid-step overhead, but with
    >= 2 grid steps when the batch allows it so v7x's two TensorCores both get work."""
    if B <= _SUBLANE:
        return B  # single full-extent block (legal even when B < 8)
    bb = min(2048, _round_up(B, _SUBLANE))
    bb = min(bb, _round_up((B + 1) // 2, _SUBLANE))
    return bb


@functools.partial(jax.jit, static_argnames=("block_b",))
def _forward_impl(x, p, *, block_b):
    B = x.shape[0]
    xf = jnp.reshape(x, (B, -1)).astype(jnp.bfloat16)  # contiguous().view(B,-1), bf16 I/O
    F = xf.shape[1]
    H = p["w1"].shape[1]
    OP = p["wh"].shape[1]
    grid = (pl.cdiv(B, block_b),)
    out = pl.pallas_call(
        _mlp_kernel,
        out_shape=jax.ShapeDtypeStruct((B, OP), jnp.float32),
        grid_spec=pltpu.PrefetchScalarGridSpec(
            num_scalar_prefetch=0,
            grid=grid,
            in_specs=[
                pl.BlockSpec((block_b, F), lambda i: (i, 0)),  # activations, tiled on batch
                pl.BlockSpec((F, H), lambda i: (0, 0)),        # weights: constant block index,
                pl.BlockSpec((1, H), lambda i: (0, 0)),        #   DMA'd once, reused each step
                pl.BlockSpec((H, H), lambda i: (0, 0)),
                pl.BlockSpec((1, H), lambda i: (0, 0)),
                pl.BlockSpec((H, OP), lambda i: (0, 0)),
                pl.BlockSpec((1, OP), lambda i: (0, 0)),
            ],
            out_specs=pl.BlockSpec((block_b, OP), lambda i: (i, 0)),
        ),
        compiler_params=pltpu.CompilerParams(
            # Batch tiles are independent -> shards across the 2 TCs on v7x.
            dimension_semantics=("parallel",),
        ),
    )(xf, p["w1"], p["b1"], p["w2"], p["b2"], p["wh"], p["bh"])
    logits = out[:, :2]   # classifier head
    risk = out[:, 2]      # risk head, already squeezed
    return logits, risk


def deepsurv_mlp_forward(x, packed_params):
    """x: (B, window_size, input_dim). Returns (classification_logits (B,2), risk (B,))."""
    return _forward_impl(x, packed_params, block_b=_choose_block_b(x.shape[0]))


if __name__ == "__main__":
    # Small shapes consistent with the module: batch=2, window_size=8, input_dim=4,
    # hidden_dim=32, num_layers=2  ->  flatten_dim = 32.
    B, WINDOW, INPUT_DIM, HIDDEN = 2, 8, 4, 32
    F = INPUT_DIM * WINDOW

    key = jax.random.PRNGKey(0)
    ks = jax.random.split(key, 9)
    x = jax.random.normal(ks[0], (B, WINDOW, INPUT_DIM), dtype=jnp.float32)

    scale = 0.1
    params = dict(
        w1=scale * jax.random.normal(ks[1], (F, HIDDEN), jnp.float32),
        b1=scale * jax.random.normal(ks[2], (HIDDEN,), jnp.float32),
        w2=scale * jax.random.normal(ks[3], (HIDDEN, HIDDEN), jnp.float32),
        b2=scale * jax.random.normal(ks[4], (HIDDEN,), jnp.float32),
        wc=scale * jax.random.normal(ks[5], (HIDDEN, 2), jnp.float32),
        bc=scale * jax.random.normal(ks[6], (2,), jnp.float32),
        wr=scale * jax.random.normal(ks[7], (HIDDEN, 1), jnp.float32),
        br=scale * jax.random.normal(ks[8], (1,), jnp.float32),
    )

    packed = pack_deepsurv_params(params)
    logits, risk = deepsurv_mlp_forward(x, packed)
    logits, risk = jax.block_until_ready((logits, risk))

    # Pure-JAX f32 reference (eval-mode forward: dropout = identity).
    # Kernel uses bf16 inputs/weights with f32 accumulation -> relaxed tolerance.
    xf = x.reshape(B, -1)
    h = jnp.maximum(xf @ params["w1"] + params["b1"], 0.0)
    h = jnp.maximum(h @ params["w2"] + params["b2"], 0.0)
    ref_logits = h @ params["wc"] + params["bc"]
    ref_risk = (h @ params["wr"] + params["br"])[:, 0]

    np.testing.assert_allclose(np.asarray(logits), np.asarray(ref_logits), rtol=5e-2, atol=5e-3)
    np.testing.assert_allclose(np.asarray(risk), np.asarray(ref_risk), rtol=5e-2, atol=5e-3)

    print("KERNEL_OK")
</pallas_src>

<mosaic_0001>
module attributes {stable_mosaic.version = 11 : i64} {
  func.func @_mlp_kernel(%arg0: i32, %arg1: memref<2x32xbf16, #tpu.memory_space<vmem>>, %arg2: memref<32x32xbf16, #tpu.memory_space<vmem>>, %arg3: memref<1x32xf32, #tpu.memory_space<vmem>>, %arg4: memref<32x32xbf16, #tpu.memory_space<vmem>>, %arg5: memref<1x32xf32, #tpu.memory_space<vmem>>, %arg6: memref<32x8xbf16, #tpu.memory_space<vmem>>, %arg7: memref<1x8xf32, #tpu.memory_space<vmem>>, %arg8: memref<2x8xf32, #tpu.memory_space<vmem>>) attributes {dimension_semantics = [#tpu.dimension_semantics<parallel>], iteration_bounds = array<i64: 1>, scalar_prefetch = 0 : i64, scratch_operands = 0 : i64, tpu.core_type = #tpu.core_type<tc>, window_params = [{transform_indices = @transform_0, window_bounds = array<i64: 2, 32>}, {pipeline_mode = #tpu.pipeline_mode<synchronous>, transform_indices = @transform_1, window_bounds = array<i64: 32, 32>}, {pipeline_mode = #tpu.pipeline_mode<synchronous>, transform_indices = @transform_2, window_bounds = array<i64: 1, 32>}, {pipeline_mode = #tpu.pipeline_mode<synchronous>, transform_indices = @transform_3, window_bounds = array<i64: 32, 32>}, {pipeline_mode = #tpu.pipeline_mode<synchronous>, transform_indices = @transform_4, window_bounds = array<i64: 1, 32>}, {pipeline_mode = #tpu.pipeline_mode<synchronous>, transform_indices = @transform_5, window_bounds = array<i64: 32, 8>}, {pipeline_mode = #tpu.pipeline_mode<synchronous>, transform_indices = @transform_6, window_bounds = array<i64: 1, 8>}, {transform_indices = @transform_7, window_bounds = array<i64: 2, 8>}]} {
    %c0 = arith.constant 0 : index
    %c0_0 = arith.constant 0 : index
    %0 = vector.load %arg1[%c0, %c0_0] : memref<2x32xbf16, #tpu.memory_space<vmem>>, vector<2x32xbf16>
    %c0_1 = arith.constant 0 : index
    %c0_2 = arith.constant 0 : index
    %1 = vector.load %arg2[%c0_1, %c0_2] : memref<32x32xbf16, #tpu.memory_space<vmem>>, vector<32x32xbf16>
    %cst = arith.constant dense<0.000000e+00> : vector<2x32xf32>
    %2 = tpu.matmul %0, %1, %cst {dimension_numbers = #tpu.dot_dimension_numbers<[1], [0], [0], [1], [0, 0, 1, 1], [], []>} : vector<2x32xbf16>, vector<32x32xbf16>, vector<2x32xf32> -> vector<2x32xf32>
    %c0_3 = arith.constant 0 : index
    %c0_4 = arith.constant 0 : index
    %3 = vector.load %arg3[%c0_3, %c0_4] : memref<1x32xf32, #tpu.memory_space<vmem>>, vector<1x32xf32>
    %4 = vector.broadcast %3 : vector<1x32xf32> to vector<2x32xf32>
    %5 = arith.addf %2, %4 : vector<2x32xf32>
    %cst_5 = arith.constant 0.000000e+00 : f32
    %6 = vector.broadcast %cst_5 : f32 to vector<2x32xf32>
    %7 = arith.maximumf %5, %6 : vector<2x32xf32>
    %8 = arith.truncf %7 : vector<2x32xf32> to vector<2x32xbf16>
    %c0_6 = arith.constant 0 : index
    %c0_7 = arith.constant 0 : index
    %9 = vector.load %arg4[%c0_6, %c0_7] : memref<32x32xbf16, #tpu.memory_space<vmem>>, vector<32x32xbf16>
    %cst_8 = arith.constant dense<0.000000e+00> : vector<2x32xf32>
    %10 = tpu.matmul %8, %9, %cst_8 {dimension_numbers = #tpu.dot_dimension_numbers<[1], [0], [0], [1], [0, 0, 1, 1], [], []>} : vector<2x32xbf16>, vector<32x32xbf16>, vector<2x32xf32> -> vector<2x32xf32>
    %c0_9 = arith.constant 0 : index
    %c0_10 = arith.constant 0 : index
    %11 = vector.load %arg5[%c0_9, %c0_10] : memref<1x32xf32, #tpu.memory_space<vmem>>, vector<1x32xf32>
    %12 = vector.broadcast %11 : vector<1x32xf32> to vector<2x32xf32>
    %13 = arith.addf %10, %12 : vector<2x32xf32>
    %cst_11 = arith.constant 0.000000e+00 : f32
    %14 = vector.broadcast %cst_11 : f32 to vector<2x32xf32>
    %15 = arith.maximumf %13, %14 : vector<2x32xf32>
    %16 = arith.truncf %15 : vector<2x32xf32> to vector<2x32xbf16>
    %c0_12 = arith.constant 0 : index
    %c0_13 = arith.constant 0 : index
    %17 = vector.load %arg6[%c0_12, %c0_13] : memref<32x8xbf16, #tpu.memory_space<vmem>>, vector<32x8xbf16>
    %cst_14 = arith.constant dense<0.000000e+00> : vector<2x8xf32>
    %18 = tpu.matmul %16, %17, %cst_14 {dimension_numbers = #tpu.dot_dimension_numbers<[1], [0], [0], [1], [0, 0, 1, 1], [], []>} : vector<2x32xbf16>, vector<32x8xbf16>, vector<2x8xf32> -> vector<2x8xf32>
    %c0_15 = arith.constant 0 : index
    %c0_16 = arith.constant 0 : index
    %19 = vector.load %arg7[%c0_15, %c0_16] : memref<1x8xf32, #tpu.memory_space<vmem>>, vector<1x8xf32>
    %20 = vector.broadcast %19 : vector<1x8xf32> to vector<2x8xf32>
    %21 = arith.addf %18, %20 : vector<2x8xf32>
    %c0_17 = arith.constant 0 : index
    %c0_18 = arith.constant 0 : index
    %22 = vector.load %arg8[%c0_17, %c0_18] : memref<2x8xf32, #tpu.memory_space<vmem>>, vector<2x8xf32>
    tpu.vector_store %arg8[%c0_17, %c0_18], %21 {strides = array<i32>} : memref<2x8xf32, #tpu.memory_space<vmem>>, vector<2x8xf32>,
    return
  }
  func.func @transform_0(%arg0: i32) -> (i32, i32) {
    %c0_i32 = arith.constant 0 : i32
    %c0_i32_0 = arith.constant 0 : i32
    return %arg0, %c0_i32 : i32, i32
  }
  func.func @transform_1(%arg0: i32) -> (i32, i32) {
    %c0_i32 = arith.constant 0 : i32
    %c0_i32_0 = arith.constant 0 : i32
    %c0_i32_1 = arith.constant 0 : i32
    return %c0_i32, %c0_i32_0 : i32, i32
  }
  func.func @transform_2(%arg0: i32) -> (i32, i32) {
    %c0_i32 = arith.constant 0 : i32
    %c0_i32_0 = arith.constant 0 : i32
    %c0_i32_1 = arith.constant 0 : i32
    return %c0_i32, %c0_i32_0 : i32, i32
  }
  func.func @transform_3(%arg0: i32) -> (i32, i32) {
    %c0_i32 = arith.constant 0 : i32
    %c0_i32_0 = arith.constant 0 : i32
    %c0_i32_1 = arith.constant 0 : i32
    return %c0_i32, %c0_i32_0 : i32, i32
  }
  func.func @transform_4(%arg0: i32) -> (i32, i32) {
    %c0_i32 = arith.constant 0 : i32
    %c0_i32_0 = arith.constant 0 : i32
    %c0_i32_1 = arith.constant 0 : i32
    return %c0_i32, %c0_i32_0 : i32, i32
  }
  func.func @transform_5(%arg0: i32) -> (i32, i32) {
    %c0_i32 = arith.constant 0 : i32
    %c0_i32_0 = arith.constant 0 : i32
    %c0_i32_1 = arith.constant 0 : i32
    return %c0_i32, %c0_i32_0 : i32, i32
  }
  func.func @transform_6(%arg0: i32) -> (i32, i32) {
    %c0_i32 = arith.constant 0 : i32
    %c0_i32_0 = arith.constant 0 : i32
    %c0_i32_1 = arith.constant 0 : i32
    return %c0_i32, %c0_i32_0 : i32, i32
  }
  func.func @transform_7(%arg0: i32) -> (i32, i32) {
    %c0_i32 = arith.constant 0 : i32
    %c0_i32_0 = arith.constant 0 : i32
    return %arg0, %c0_i32 : i32, i32
  }
}

</mosaic_0001>

<bundles_post_ra>
// kernel: _forward_impl.1
= control target key start
LH: loop header
LB: loop body
LE: loop exit
PB: predicated region body
PF: predicated region fallthrough
CT: control target
= control target key end

     0   :  { %v290_v0 = vmov 0.0   ;;  %vm291_vm0 = vmmov 0   ;;  %vm51_vm1 = vcmask 261120   ;;  %vm231_vm2 = vcmask 58368   ;;  %s368_s1 = inlined_call_operand.vmem [shape: bf16[32,32], index: 1, kind: input, shape index: {}]   ;;  %s369_s0 = inlined_call_operand.vmem [shape: bf16[2,32], index: 0, kind: input, shape index: {}]   ;;  %s370_s3 = inlined_call_operand.vmem [shape: bf16[32,32], index: 3, kind: input, shape index: {}]   ;;  %s371_s5 = inlined_call_operand.vmem [shape: bf16[32,8], index: 5, kind: input, shape index: {}]   ;;  %s372_s2 = inlined_call_operand.vmem [shape: f32[1,32], index: 2, kind: input, shape index: {}]   ;;  %s373_s4 = inlined_call_operand.vmem [shape: f32[1,32], index: 4, kind: input, shape index: {}]   ;;  %s374_s6 = inlined_call_operand.vmem [shape: f32[1,8], index: 6, kind: input, shape index: {}]   ;;  %s375_s7 = inlined_call_operand.vmem [shape: f32[2,8], index: 7, kind: output, shape index: {}]  }
   0x1   :  { %258 = vmatprep.subr.bf16.mxu0 %v290_v0  ;;  %v284_v1 = vld [vmem:[%s368_s1] sm:$0xff]   ;;  %262 = vmatprep.mubr.msk.bf16.mxu0 %vm291_vm0, %v290_v0  ;;  %v285_v2 = vld [vmem:[%s368_s1 + $0x8] sm:$0xff]  }
   0x2   :  { %266 = vmatprep.subr.bf16.mxu1 %v290_v0  ;;  %270 = vmatprep.mubr.msk.bf16.mxu1 %vm291_vm0, %v290_v0  ;;  %v27_v3 = vld [vmem:[%s369_s0] sm:$0x1]  ;;  %v287_v5 = vld [vmem:[%s370_s3 + $0x8] sm:$0xff]  }
   0x3   :  { %259 = vmatpush3.bf16.msra.mxu0 %v284_v1  ;;  %v286_v4 = vld [vmem:[%s370_s3] sm:$0xff]   ;;  %v289_v15 = vld [vmem:[%s371_s5 + $0x8] sm:$0xff]  }
   0x4   :  { %260 = vmatprep.subr.bf16.mxu0 %v290_v0  ;;  %267 = vmatpush3.bf16.msra.mxu1 %v286_v4  ;;  %v288_v6 = vld [vmem:[%s371_s5] sm:$0xff]  }
   0x5   :  { %268 = vmatprep.subr.bf16.mxu1 %v290_v0  ;;  %v237_v7 = vld [vmem:[%s372_s2] ss:$0 sm:$0xff] }
   0x6   :  { %v241_v16 = vld [vmem:[%s373_s4] ss:$0 sm:$0xff] }
   0x7   :  { %261 = vmatpush3.bf16.msra.mxu0 %v285_v2  ;;  %v245_v24 = vld [vmem:[%s374_s6] ss:$0 sm:$0xff] }
   0x8   :  { %274 = vmatprep.subr.bf16.mxu0 %v290_v0  ;;  %269 = vmatpush3.bf16.msra.mxu1 %v287_v5 }
   0xa   :  { %263 = vmatmul.mubr.msk.bf16.vlgmr.msra.gmra.mrb[0].mxu0 %vm51_vm1, %v27_v3 }
   0xb   :  { %278 = vmatprep.mubr.msk.bf16.mxu0 %vm291_vm0, %v290_v0  ;;  %275 = vmatpush3.bf16.msra.mxu0 %v288_v6 }
   0xc   :  { %276 = vmatprep.subr.bf16.mxu0 %v290_v0 }
   0xf   :  { %277 = vmatpush3.bf16.msra.mxu0 %v289_v15 }
  0xdd   :  { %v89_v8 = vpop.f32.mrb[0].mxu0 }
  0xde   :  { %v90_v9 = vadd.f32 %v237_v7, %v89_v8  ;;  %v264_v10 = vpop.f32.mrb[1].mxu0 }
  0xdf   :  { %v92_v11 = vpop.f32.mrb[2].mxu0 }
  0xe0   :  { %v95_v12 = vmax.f32 %v90_v9, 0.0  ;;  %v265_v13 = vpop.f32.mrb[3].mxu0 }
  0xe2   :  { %v96_v14 = vpack.c.bf16 %v95_v12, %v95_v12 }
  0xe4   :  { %271 = vmatmul.mubr.msk.bf16.vlgmr.msra.gmra.mrb[0].mxu1 %vm51_vm1, %v96_v14 }
 0x1b7   :  { %v157_v17 = vpop.f32.mrb[0].mxu1 }
 0x1b8   :  { %v158_v18 = vadd.f32 %v241_v16, %v157_v17  ;;  %v272_v19 = vpop.f32.mrb[1].mxu1 }
 0x1b9   :  { %v160_v20 = vpop.f32.mrb[2].mxu1 }
 0x1ba   :  { %v163_v21 = vmax.f32 %v158_v18, 0.0  ;;  %v273_v22 = vpop.f32.mrb[3].mxu1 }
 0x1bc   :  { %v164_v23 = vpack.c.bf16 %v163_v21, %v163_v21 }
 0x1be   :  { %279 = vmatmul.mubr.msk.bf16.vlgmr.msra.gmra.mrb[4].mxu0 %vm51_vm1, %v164_v23 }
 0x291   :  { %v225_v25 = vpop.f32.mrb[4].mxu0 }
 0x292   :  { %v226_v26 = vadd.f32 %v245_v24, %v225_v25  ;;  %v280_v27 = vpop.f32.mrb[5].mxu0 }
 0x293   :  { %v228_v28 = vpop.f32.mrb[6].mxu0 }
 0x294   :  { %232 = vst.msk [vmem:[%s375_s7] sm:$0x3] %vm231_vm2, %v226_v26  ;;  %v281_v29 = vpop.f32.mrb[7].mxu0 }

</bundles_post_ra>
